<compile_context>
chip_gen: v7x
topology: tpu7x:2x2x1
jax: 0.10.0
libtpu: 0.0.40
codegen_flags: <defaults>
</compile_context>

<pallas_src>
import functools
import math

import jax
import jax.numpy as jnp
from jax.experimental import pallas as pl
from jax.experimental.pallas import tpu as pltpu


# ---------------------------------------------------------------------------
# Per-chip tuning knobs.
# ---------------------------------------------------------------------------
def _device_defaults():
    """Returns (tile_rows, vmem_limit_bytes, gelu_bf16)."""
    try:
        kind = jax.devices()[0].device_kind.lower()
    except Exception:
        kind = ""
    if "v6" in kind:                       # v6e: 128 MiB VMEM, 256-wide MXU, bf16 EUP
        return 256, 96 * 1024 * 1024, True
    if "v7" in kind:                       # v7x: same MXU but only 64 MiB VMEM
        return 256, 48 * 1024 * 1024, True
    if "v5 lite" in kind or "v5e" in kind:  # v5e: 128-wide MXU, no bf16 VPU/EUP
        return 256, 64 * 1024 * 1024, False
    return 128, 32 * 1024 * 1024, False


def _pick_tile(T, target):
    for cand in (target, 512, 256, 128, 64, 32, 16, 8):
        if cand <= T and T % cand == 0:
            return cand
    return T


def _pick_head_group(n_head, hd, C):
    """Heads per attention grid step so the merged output slab is lane-dense
    ((hpb*hd) % 128 == 0) or equals the full feature dim C."""
    if C % 128 == 0:
        for hpb in range(1, n_head + 1):
            if n_head % hpb == 0 and (hpb * hd) % 128 == 0:
                return hpb
    return n_head


# ---------------------------------------------------------------------------
# Kernel 1: LayerNorm(ln_1) + fused QKV projection, head-major outputs.
# grid = (B, token_tiles)
# ---------------------------------------------------------------------------
def _ln_qkv_kernel(x_ref, g_ref, b_ref, w_ref, bias_ref,
                   q_out, k_out, v_out, *, n_head, scale, eps):
    x = x_ref[0]                                         # (TQ, C) f32
    mu = jnp.mean(x, axis=-1, keepdims=True)
    xc = x - mu
    var = jnp.mean(xc * xc, axis=-1, keepdims=True)
    xn = xc * jax.lax.rsqrt(var + eps) * g_ref[...] + b_ref[...]

    # one fused MXU pass: (TQ, C) @ (C, 3C) with f32 accumulation
    qkv = jnp.dot(xn.astype(w_ref.dtype), w_ref[...],
                  preferred_element_type=jnp.float32) + bias_ref[...]

    tq, c3 = qkv.shape
    C = c3 // 3
    hd = C // n_head

    # in-kernel head split to (n_head, TQ, hd) using only well-supported
    # relayouts: 2-D transpose, sublane-dim (leading) reshape, batched
    # last-two-dims transpose.  Done in VMEM -> no HBM transpose round trips.
    qkv_t = qkv.T                                        # (3C, TQ)

    def to_heads(rows):                                  # rows: (C, TQ)
        r = rows.reshape(n_head, hd, tq)                 # sublane-dim split
        return jnp.transpose(r, (0, 2, 1))               # (n_head, TQ, hd)

    q_out[0] = (to_heads(qkv_t[:C]) * scale).astype(q_out.dtype)   # fold 1/sqrt(hd)
    k_out[0] = to_heads(qkv_t[C:2 * C]).astype(k_out.dtype)
    v_out[0] = to_heads(qkv_t[2 * C:]).astype(v_out.dtype)


# ---------------------------------------------------------------------------
# Kernel 2: flash-style causal attention over head groups.
# grid = (B, head_groups, q_tiles, k_tiles); k/v DMAs for masked tiles skipped
# via the clamped index_map; output written lane-dense straight into (B, T, C).
# ---------------------------------------------------------------------------
def _flash_attn_kernel(q_ref, k_ref, v_ref, o_ref, m_sc, l_sc, acc_sc, *, tile):
    qi = pl.program_id(2)
    ki = pl.program_id(3)

    @pl.when(ki == 0)
    def _init():
        m_sc[...] = jnp.full_like(m_sc, -jnp.inf)
        l_sc[...] = jnp.zeros_like(l_sc)
        acc_sc[...] = jnp.zeros_like(acc_sc)

    @pl.when(ki <= qi)          # future key tiles: no compute (and no DMA either)
    def _update():
        q = q_ref[0]            # (hpb, tile, hd) bf16, pre-scaled by 1/sqrt(hd)
        k = k_ref[0]
        v = v_ref[0]

        s = jnp.einsum("hqd,hkd->hqk", q, k,
                       preferred_element_type=jnp.float32)   # (hpb, tile, tile)

        # tile-local causal mask from global row/col offsets (no (T,T) mask)
        row = qi * tile + jax.lax.broadcasted_iota(jnp.int32, (tile, tile), 0)
        col = ki * tile + jax.lax.broadcasted_iota(jnp.int32, (tile, tile), 1)
        s = jnp.where((row >= col)[None, :, :], s, -jnp.inf)

        m_prev = m_sc[...]
        m_new = jnp.maximum(m_prev, jnp.max(s, axis=-1, keepdims=True))
        alpha = jnp.exp(m_prev - m_new)
        p = jnp.exp(s - m_new)

        l_sc[...] = alpha * l_sc[...] + jnp.sum(p, axis=-1, keepdims=True)
        acc_sc[...] = alpha * acc_sc[...] + jnp.einsum(
            "hqk,hkd->hqd", p.astype(v.dtype), v,
            preferred_element_type=jnp.float32)
        m_sc[...] = m_new

    @pl.when(ki == qi)          # last contributing key tile for this query tile
    def _finalize():
        inv_l = pl.reciprocal(l_sc[...], approx=True)    # EUP instead of VALU div
        out = acc_sc[...] * inv_l                        # (hpb, tile, hd) f32
        hpb, _, hd = out.shape
        # merge heads in VMEM -> lane-dense (tile, hpb*hd) store into (B, T, C)
        out = jnp.transpose(out, (0, 2, 1))              # (hpb, hd, tile)
        out = out.reshape(hpb * hd, tile)                # sublane-dim merge
        o_ref[0] = out.T.astype(o_ref.dtype)             # (tile, hpb*hd)


# ---------------------------------------------------------------------------
# Kernel 3: attention output projection + residual, LayerNorm(ln_2),
# MLP (c_fc -> tanh-GELU -> c_proj) + residual.   grid = (B, token_tiles)
# ---------------------------------------------------------------------------
def _proj_mlp_kernel(y_ref, x_ref, wcp_ref, bcp_ref, g2_ref, b2_ref,
                     wfc_ref, bfc_ref, wmp_ref, bmp_ref, o_ref,
                     *, eps, gelu_bf16):
    attn = jnp.dot(y_ref[0], wcp_ref[...],
                   preferred_element_type=jnp.float32) + bcp_ref[...]
    x1 = x_ref[0] + attn                                 # first residual, f32

    mu = jnp.mean(x1, axis=-1, keepdims=True)
    xc = x1 - mu
    var = jnp.mean(xc * xc, axis=-1, keepdims=True)
    xn = xc * jax.lax.rsqrt(var + eps) * g2_ref[...] + b2_ref[...]

    h = jnp.dot(xn.astype(wfc_ref.dtype), wfc_ref[...],
                preferred_element_type=jnp.float32) + bfc_ref[...]
    # GELU, tanh approximation (matches nn.GELU(approximate='tanh')).
    # Inner polynomial stays f32; only the tanh uses bf16 on chips with a
    # bf16 EUP (v6e/v7x) -- roughly doubles transcendental throughput.
    u = 0.7978845608028654 * (h + 0.044715 * h * h * h)
    if gelu_bf16:
        t = jnp.tanh(u.astype(jnp.bfloat16)).astype(jnp.float32)
    else:
        t = jnp.tanh(u)
    h = 0.5 * h * (1.0 + t)

    m = jnp.dot(h.astype(wmp_ref.dtype), wmp_ref[...],
                preferred_element_type=jnp.float32) + bmp_ref[...]
    o_ref[0] = (x1 + m).astype(o_ref.dtype)              # second residual


# ---------------------------------------------------------------------------
# Wrapper: parameter layout prep + three pallas_calls.
# ---------------------------------------------------------------------------
def gpt2_block_forward(x, params, n_head, tile_t=None):
    B, T, C = x.shape
    assert C % n_head == 0
    hd = C // n_head

    tile_default, vmem_limit, gelu_bf16 = _device_defaults()
    if tile_t is None:
        tile_t = _pick_tile(T, tile_default)
    assert T % tile_t == 0
    nt = T // tile_t

    hpb = _pick_head_group(n_head, hd, C)
    n_grp = n_head // hpb

    f32, bf16 = jnp.float32, jnp.bfloat16
    eps = 1e-5
    x = x.astype(f32)

    # torch Linear weights are (out, in) -> transpose to (in, out); MXU
    # operands stored as bf16, biases / LN params as f32 row vectors.
    w_qkv = jnp.asarray(params["w_attn"]).T.astype(bf16)            # (C, 3C)
    b_qkv = jnp.asarray(params["b_attn"]).reshape(1, 3 * C).astype(f32)
    g1 = jnp.asarray(params["ln1_g"]).reshape(1, C).astype(f32)
    be1 = jnp.asarray(params["ln1_b"]).reshape(1, C).astype(f32)
    wcp = jnp.asarray(params["w_cproj"]).T.astype(bf16)             # (C, C)
    bcp = jnp.asarray(params["b_cproj"]).reshape(1, C).astype(f32)
    g2 = jnp.asarray(params["ln2_g"]).reshape(1, C).astype(f32)
    be2 = jnp.asarray(params["ln2_b"]).reshape(1, C).astype(f32)
    wfc = jnp.asarray(params["w_fc"]).T.astype(bf16)                # (C, 4C)
    bfc = jnp.asarray(params["b_fc"]).reshape(1, 4 * C).astype(f32)
    wmp = jnp.asarray(params["w_mproj"]).T.astype(bf16)             # (4C, C)
    bmp = jnp.asarray(params["b_mproj"]).reshape(1, C).astype(f32)

    def const_spec(shape):
        # constant block index => no pipelining benefit; single-buffer to halve
        # the resident VMEM footprint of weights / biases / LN params.
        return pl.BlockSpec(shape, lambda *_: (0,) * len(shape),
                            pipeline_mode=pl.Buffered(1))

    cp_2d = pltpu.CompilerParams(
        dimension_semantics=("parallel", "parallel"),
        vmem_limit_bytes=vmem_limit)

    # ---- kernel 1: LN1 + fused QKV projection (head-major outputs) --------
    q, k, v = pl.pallas_call(
        functools.partial(_ln_qkv_kernel, n_head=n_head,
                          scale=1.0 / math.sqrt(hd), eps=eps),
        out_shape=(jax.ShapeDtypeStruct((B, n_head, T, hd), bf16),) * 3,
        grid=(B, nt),
        in_specs=[
            pl.BlockSpec((1, tile_t, C), lambda b, t: (b, t, 0)),   # x
            const_spec((1, C)),                                     # ln1 gamma
            const_spec((1, C)),                                     # ln1 beta
            const_spec((C, 3 * C)),                                 # fused W_qkv
            const_spec((1, 3 * C)),                                 # fused b_qkv
        ],
        out_specs=(pl.BlockSpec((1, n_head, tile_t, hd),
                                lambda b, t: (b, 0, t, 0)),) * 3,
        compiler_params=cp_2d,
        cost_estimate=pl.CostEstimate(
            flops=2 * B * T * C * 3 * C,
            transcendentals=B * T,
            bytes_accessed=4 * B * T * C + 2 * C * 3 * C + 3 * 2 * B * T * C),
    )(x, g1, be1, w_qkv, b_qkv)

    # ---- kernel 2: flash causal attention, writes (B, T, C) directly ------
    y = pl.pallas_call(
        functools.partial(_flash_attn_kernel, tile=tile_t),
        out_shape=jax.ShapeDtypeStruct((B, T, C), bf16),
        grid=(B, n_grp, nt, nt),
        in_specs=[
            pl.BlockSpec((1, hpb, tile_t, hd),
                         lambda b, g, qi, ki: (b, g, qi, 0)),
            # clamp to the diagonal: future (fully masked) key tiles keep the
            # previous block index -> Pallas skips their DMA entirely.
            pl.BlockSpec((1, hpb, tile_t, hd),
                         lambda b, g, qi, ki: (b, g, jnp.minimum(ki, qi), 0)),
            pl.BlockSpec((1, hpb, tile_t, hd),
                         lambda b, g, qi, ki: (b, g, jnp.minimum(ki, qi), 0)),
        ],
        out_specs=pl.BlockSpec((1, tile_t, hpb * hd),
                               lambda b, g, qi, ki: (b, qi, g)),
        scratch_shapes=[
            pltpu.VMEM((hpb, tile_t, 1), jnp.float32),    # running max
            pltpu.VMEM((hpb, tile_t, 1), jnp.float32),    # running sum
            pltpu.VMEM((hpb, tile_t, hd), jnp.float32),   # running accumulator
        ],
        compiler_params=pltpu.CompilerParams(
            dimension_semantics=("parallel", "parallel", "parallel", "arbitrary"),
            vmem_limit_bytes=vmem_limit),
        cost_estimate=pl.CostEstimate(
            flops=4 * B * n_head * T * T * hd,
            transcendentals=B * n_head * T * T,
            bytes_accessed=3 * 2 * B * T * C + 2 * B * T * C),
    )(q, k, v)

    # ---- kernel 3: c_proj + residual + LN2 + MLP + residual ----------------
    out = pl.pallas_call(
        functools.partial(_proj_mlp_kernel, eps=eps, gelu_bf16=gelu_bf16),
        out_shape=jax.ShapeDtypeStruct((B, T, C), x.dtype),
        grid=(B, nt),
        in_specs=[
            pl.BlockSpec((1, tile_t, C), lambda b, t: (b, t, 0)),   # y (attn)
            pl.BlockSpec((1, tile_t, C), lambda b, t: (b, t, 0)),   # x (residual)
            const_spec((C, C)),                                     # w_cproj
            const_spec((1, C)),                                     # b_cproj
            const_spec((1, C)),                                     # ln2 gamma
            const_spec((1, C)),                                     # ln2 beta
            const_spec((C, 4 * C)),                                 # w_fc
            const_spec((1, 4 * C)),                                 # b_fc
            const_spec((4 * C, C)),                                 # w_mproj
            const_spec((1, C)),                                     # b_mproj
        ],
        out_specs=pl.BlockSpec((1, tile_t, C), lambda b, t: (b, t, 0)),
        compiler_params=cp_2d,
        cost_estimate=pl.CostEstimate(
            flops=2 * B * T * (C * C + 2 * 4 * C * C),
            transcendentals=B * T * (4 * C + 1),
            bytes_accessed=2 * B * T * C + 8 * B * T * C + 2 * 9 * C * C),
    )(y, x, wcp, bcp, g2, be2, wfc, bfc, wmp, bmp)
    return out


# ---------------------------------------------------------------------------
# Pure-JAX f32 reference mirroring the PyTorch Block forward.
# ---------------------------------------------------------------------------
def _reference_block(x, p, n_head):
    B, T, C = x.shape
    hd = C // n_head
    eps = 1e-5

    def ln(z, g, b):
        mu = z.mean(-1, keepdims=True)
        var = ((z - mu) ** 2).mean(-1, keepdims=True)
        return (z - mu) * jax.lax.rsqrt(var + eps) * g + b

    h = ln(x, p["ln1_g"], p["ln1_b"])
    qkv = h @ p["w_attn"].T + p["b_attn"]
    q, k, v = jnp.split(qkv, 3, axis=-1)

    def heads(t):
        return t.reshape(B, T, n_head, hd).transpose(0, 2, 1, 3)
    q, k, v = heads(q), heads(k), heads(v)
    s = jnp.einsum("bhtd,bhsd->bhts", q, k) / math.sqrt(hd)
    mask = jnp.tril(jnp.ones((T, T), dtype=bool))
    s = jnp.where(mask[None, None], s, -jnp.inf)
    a = jax.nn.softmax(s, axis=-1)
    y = jnp.einsum("bhts,bhsd->bhtd", a, v)
    y = y.transpose(0, 2, 1, 3).reshape(B, T, C)
    x = x + y @ p["w_cproj"].T + p["b_cproj"]

    h = ln(x, p["ln2_g"], p["ln2_b"])
    h = h @ p["w_fc"].T + p["b_fc"]
    h = 0.5 * h * (1.0 + jnp.tanh(0.7978845608028654 * (h + 0.044715 * h ** 3)))
    x = x + h @ p["w_mproj"].T + p["b_mproj"]
    return x


if __name__ == "__main__":
    # Small GPTConfig-consistent shapes: n_embd=32, n_head=4, T=8, B=2
    B, T, C, n_head = 2, 8, 32, 4

    key = jax.random.PRNGKey(0)
    keys = jax.random.split(key, 13)

    def nrm(kk, shape, s):
        return s * jax.random.normal(kk, shape, dtype=jnp.float32)

    x = jax.random.normal(keys[0], (B, T, C), dtype=jnp.float32)
    params = {
        "ln1_g": 1.0 + nrm(keys[1], (C,), 0.2),
        "ln1_b": nrm(keys[2], (C,), 0.2),
        "w_attn": nrm(keys[3], (3 * C, C), 0.05),    # torch layout (out, in)
        "b_attn": nrm(keys[4], (3 * C,), 0.05),
        "w_cproj": nrm(keys[5], (C, C), 0.05),
        "b_cproj": nrm(keys[6], (C,), 0.05),
        "ln2_g": 1.0 + nrm(keys[7], (C,), 0.2),
        "ln2_b": nrm(keys[8], (C,), 0.2),
        "w_fc": nrm(keys[9], (4 * C, C), 0.05),
        "b_fc": nrm(keys[10], (4 * C,), 0.05),
        "w_mproj": nrm(keys[11], (C, 4 * C), 0.05),
        "b_mproj": nrm(keys[12], (C,), 0.05),
    }

    out = gpt2_block_forward(x, params, n_head)
    out = jax.block_until_ready(out)

    ref = _reference_block(x, params, n_head)
    assert out.shape == (B, T, C)
    max_err = float(jnp.max(jnp.abs(out - ref)))
    # bf16 MXU operands + approx reciprocal -> slightly looser tolerance than f32
    assert jnp.allclose(out, ref, atol=2e-2, rtol=2e-2), (
        f"mismatch vs reference (max abs err {max_err})")

    print("KERNEL_OK")
</pallas_src>

<mosaic_0001>
module attributes {stable_mosaic.version = 11 : i64} {
  func.func @_ln_qkv_kernel(%arg0: i32, %arg1: i32, %arg2: memref<1x8x32xf32, #tpu.memory_space<vmem>>, %arg3: memref<1x32xf32, #tpu.memory_space<vmem>>, %arg4: memref<1x32xf32, #tpu.memory_space<vmem>>, %arg5: memref<32x96xbf16, #tpu.memory_space<vmem>>, %arg6: memref<1x96xf32, #tpu.memory_space<vmem>>, %arg7: memref<1x4x8x8xbf16, #tpu.memory_space<vmem>>, %arg8: memref<1x4x8x8xbf16, #tpu.memory_space<vmem>>, %arg9: memref<1x4x8x8xbf16, #tpu.memory_space<vmem>>) attributes {dimension_semantics = [#tpu.dimension_semantics<parallel>, #tpu.dimension_semantics<parallel>], iteration_bounds = array<i64: 2, 1>, scalar_prefetch = 0 : i64, scratch_operands = 0 : i64, tpu.core_type = #tpu.core_type<tc>, window_params = [{transform_indices = @transform_0, window_bounds = array<i64: 1, 8, 32>}, {pipeline_mode = #tpu.pipeline_mode<synchronous>, transform_indices = @transform_1, window_bounds = array<i64: 1, 32>}, {pipeline_mode = #tpu.pipeline_mode<synchronous>, transform_indices = @transform_2, window_bounds = array<i64: 1, 32>}, {pipeline_mode = #tpu.pipeline_mode<synchronous>, transform_indices = @transform_3, window_bounds = array<i64: 32, 96>}, {pipeline_mode = #tpu.pipeline_mode<synchronous>, transform_indices = @transform_4, window_bounds = array<i64: 1, 96>}, {transform_indices = @transform_5, window_bounds = array<i64: 1, 4, 8, 8>}, {transform_indices = @transform_6, window_bounds = array<i64: 1, 4, 8, 8>}, {transform_indices = @transform_7, window_bounds = array<i64: 1, 4, 8, 8>}]} {
    %c0 = arith.constant 0 : index
    %c0_0 = arith.constant 0 : index
    %c0_1 = arith.constant 0 : index
    %0 = vector.load %arg2[%c0, %c0_0, %c0_1] : memref<1x8x32xf32, #tpu.memory_space<vmem>>, vector<1x8x32xf32>
    %1 = vector.shape_cast %0 : vector<1x8x32xf32> to vector<8x32xf32>
    %cst = arith.constant dense<0.000000e+00> : vector<8xf32>
    %2 = vector.multi_reduction <add>, %1, %cst [1] : vector<8x32xf32> to vector<8xf32>
    %3 = vector.shape_cast %2 : vector<8xf32> to vector<8x1xf32>
    %cst_2 = arith.constant 3.200000e+01 : f32
    %4 = vector.broadcast %cst_2 : f32 to vector<8x1xf32>
    %5 = arith.divf %3, %4 : vector<8x1xf32>
    %6 = vector.broadcast %5 : vector<8x1xf32> to vector<8x32xf32>
    %7 = arith.subf %1, %6 : vector<8x32xf32>
    %8 = arith.mulf %7, %7 : vector<8x32xf32>
    %cst_3 = arith.constant dense<0.000000e+00> : vector<8xf32>
    %9 = vector.multi_reduction <add>, %8, %cst_3 [1] : vector<8x32xf32> to vector<8xf32>
    %10 = vector.shape_cast %9 : vector<8xf32> to vector<8x1xf32>
    %cst_4 = arith.constant 3.200000e+01 : f32
    %11 = vector.broadcast %cst_4 : f32 to vector<8x1xf32>
    %12 = arith.divf %10, %11 : vector<8x1xf32>
    %cst_5 = arith.constant 9.99999974E-6 : f32
    %13 = vector.broadcast %cst_5 : f32 to vector<8x1xf32>
    %14 = arith.addf %12, %13 : vector<8x1xf32>
    %15 = math.rsqrt %14 : vector<8x1xf32>
    %16 = vector.broadcast %15 : vector<8x1xf32> to vector<8x32xf32>
    %17 = arith.mulf %7, %16 : vector<8x32xf32>
    %c0_6 = arith.constant 0 : index
    %c0_7 = arith.constant 0 : index
    %18 = vector.load %arg3[%c0_6, %c0_7] : memref<1x32xf32, #tpu.memory_space<vmem>>, vector<1x32xf32>
    %19 = vector.broadcast %18 : vector<1x32xf32> to vector<8x32xf32>
    %20 = arith.mulf %17, %19 : vector<8x32xf32>
    %c0_8 = arith.constant 0 : index
    %c0_9 = arith.constant 0 : index
    %21 = vector.load %arg4[%c0_8, %c0_9] : memref<1x32xf32, #tpu.memory_space<vmem>>, vector<1x32xf32>
    %22 = vector.broadcast %21 : vector<1x32xf32> to vector<8x32xf32>
    %23 = arith.addf %20, %22 : vector<8x32xf32>
    %24 = arith.truncf %23 : vector<8x32xf32> to vector<8x32xbf16>
    %c0_10 = arith.constant 0 : index
    %c0_11 = arith.constant 0 : index
    %25 = vector.load %arg5[%c0_10, %c0_11] : memref<32x96xbf16, #tpu.memory_space<vmem>>, vector<32x96xbf16>
    %cst_12 = arith.constant dense<0.000000e+00> : vector<8x96xf32>
    %26 = tpu.matmul %24, %25, %cst_12 {dimension_numbers = #tpu.dot_dimension_numbers<[1], [0], [0], [1], [0, 0, 1, 1], [], []>} : vector<8x32xbf16>, vector<32x96xbf16>, vector<8x96xf32> -> vector<8x96xf32>
    %c0_13 = arith.constant 0 : index
    %c0_14 = arith.constant 0 : index
    %27 = vector.load %arg6[%c0_13, %c0_14] : memref<1x96xf32, #tpu.memory_space<vmem>>, vector<1x96xf32>
    %28 = vector.broadcast %27 : vector<1x96xf32> to vector<8x96xf32>
    %29 = arith.addf %26, %28 : vector<8x96xf32>
    %30 = tpu.transpose %29, [1, 0] : vector<8x96xf32> -> vector<96x8xf32>
    %31 = vector.extract_strided_slice %30 {offsets = [0, 0], sizes = [32, 8], strides = [1, 1]} : vector<96x8xf32> to vector<32x8xf32>
    %32 = vector.shape_cast %31 : vector<32x8xf32> to vector<4x8x8xf32>
    %33 = tpu.transpose %32, [0, 2, 1] : vector<4x8x8xf32> -> vector<4x8x8xf32>
    %cst_15 = arith.constant 0.353553385 : f32
    %34 = vector.broadcast %cst_15 : f32 to vector<4x8x8xf32>
    %35 = arith.mulf %33, %34 : vector<4x8x8xf32>
    %36 = arith.truncf %35 : vector<4x8x8xf32> to vector<4x8x8xbf16>
    %c0_16 = arith.constant 0 : index
    %c0_17 = arith.constant 0 : index
    %c0_18 = arith.constant 0 : index
    %c0_19 = arith.constant 0 : index
    %37 = vector.load %arg7[%c0_16, %c0_17, %c0_18, %c0_19] : memref<1x4x8x8xbf16, #tpu.memory_space<vmem>>, vector<1x4x8x8xbf16>
    %38 = vector.shape_cast %37 : vector<1x4x8x8xbf16> to vector<4x8x8xbf16>
    %39 = vector.shape_cast %36 : vector<4x8x8xbf16> to vector<1x4x8x8xbf16>
    tpu.vector_store %arg7[%c0_16, %c0_17, %c0_18, %c0_19], %39 {strides = array<i32>} : memref<1x4x8x8xbf16, #tpu.memory_space<vmem>>, vector<1x4x8x8xbf16>,
    %40 = vector.extract_strided_slice %30 {offsets = [32, 0], sizes = [32, 8], strides = [1, 1]} : vector<96x8xf32> to vector<32x8xf32>
    %41 = vector.shape_cast %40 : vector<32x8xf32> to vector<4x8x8xf32>
    %42 = tpu.transpose %41, [0, 2, 1] : vector<4x8x8xf32> -> vector<4x8x8xf32>
    %43 = arith.truncf %42 : vector<4x8x8xf32> to vector<4x8x8xbf16>
    %c0_20 = arith.constant 0 : index
    %c0_21 = arith.constant 0 : index
    %c0_22 = arith.constant 0 : index
    %c0_23 = arith.constant 0 : index
    %44 = vector.load %arg8[%c0_20, %c0_21, %c0_22, %c0_23] : memref<1x4x8x8xbf16, #tpu.memory_space<vmem>>, vector<1x4x8x8xbf16>
    %45 = vector.shape_cast %44 : vector<1x4x8x8xbf16> to vector<4x8x8xbf16>
    %46 = vector.shape_cast %43 : vector<4x8x8xbf16> to vector<1x4x8x8xbf16>
    tpu.vector_store %arg8[%c0_20, %c0_21, %c0_22, %c0_23], %46 {strides = array<i32>} : memref<1x4x8x8xbf16, #tpu.memory_space<vmem>>, vector<1x4x8x8xbf16>,
    %47 = vector.extract_strided_slice %30 {offsets = [64, 0], sizes = [32, 8], strides = [1, 1]} : vector<96x8xf32> to vector<32x8xf32>
    %48 = vector.shape_cast %47 : vector<32x8xf32> to vector<4x8x8xf32>
    %49 = tpu.transpose %48, [0, 2, 1] : vector<4x8x8xf32> -> vector<4x8x8xf32>
    %50 = arith.truncf %49 : vector<4x8x8xf32> to vector<4x8x8xbf16>
    %c0_24 = arith.constant 0 : index
    %c0_25 = arith.constant 0 : index
    %c0_26 = arith.constant 0 : index
    %c0_27 = arith.constant 0 : index
    %51 = vector.load %arg9[%c0_24, %c0_25, %c0_26, %c0_27] : memref<1x4x8x8xbf16, #tpu.memory_space<vmem>>, vector<1x4x8x8xbf16>
    %52 = vector.shape_cast %51 : vector<1x4x8x8xbf16> to vector<4x8x8xbf16>
    %53 = vector.shape_cast %50 : vector<4x8x8xbf16> to vector<1x4x8x8xbf16>
    tpu.vector_store %arg9[%c0_24, %c0_25, %c0_26, %c0_27], %53 {strides = array<i32>} : memref<1x4x8x8xbf16, #tpu.memory_space<vmem>>, vector<1x4x8x8xbf16>,
    return
  }
  func.func @transform_0(%arg0: i32, %arg1: i32) -> (i32, i32, i32) {
    %c0_i32 = arith.constant 0 : i32
    %c0_i32_0 = arith.constant 0 : i32
    return %arg0, %arg1, %c0_i32 : i32, i32, i32
  }
  func.func @transform_1(%arg0: i32, %arg1: i32) -> (i32, i32) {
    %c0_i32 = arith.constant 0 : i32
    %c0_i32_0 = arith.constant 0 : i32
    %c0_i32_1 = arith.constant 0 : i32
    return %c0_i32, %c0_i32_0 : i32, i32
  }
  func.func @transform_2(%arg0: i32, %arg1: i32) -> (i32, i32) {
    %c0_i32 = arith.constant 0 : i32
    %c0_i32_0 = arith.constant 0 : i32
    %c0_i32_1 = arith.constant 0 : i32
    return %c0_i32, %c0_i32_0 : i32, i32
  }
  func.func @transform_3(%arg0: i32, %arg1: i32) -> (i32, i32) {
    %c0_i32 = arith.constant 0 : i32
    %c0_i32_0 = arith.constant 0 : i32
    %c0_i32_1 = arith.constant 0 : i32
    return %c0_i32, %c0_i32_0 : i32, i32
  }
  func.func @transform_4(%arg0: i32, %arg1: i32) -> (i32, i32) {
    %c0_i32 = arith.constant 0 : i32
    %c0_i32_0 = arith.constant 0 : i32
    %c0_i32_1 = arith.constant 0 : i32
    return %c0_i32, %c0_i32_0 : i32, i32
  }
  func.func @transform_5(%arg0: i32, %arg1: i32) -> (i32, i32, i32, i32) {
    %c0_i32 = arith.constant 0 : i32
    %c0_i32_0 = arith.constant 0 : i32
    %c0_i32_1 = arith.constant 0 : i32
    return %arg0, %c0_i32, %arg1, %c0_i32_0 : i32, i32, i32, i32
  }
  func.func @transform_6(%arg0: i32, %arg1: i32) -> (i32, i32, i32, i32) {
    %c0_i32 = arith.constant 0 : i32
    %c0_i32_0 = arith.constant 0 : i32
    %c0_i32_1 = arith.constant 0 : i32
    return %arg0, %c0_i32, %arg1, %c0_i32_0 : i32, i32, i32, i32
  }
  func.func @transform_7(%arg0: i32, %arg1: i32) -> (i32, i32, i32, i32) {
    %c0_i32 = arith.constant 0 : i32
    %c0_i32_0 = arith.constant 0 : i32
    %c0_i32_1 = arith.constant 0 : i32
    return %arg0, %c0_i32, %arg1, %c0_i32_0 : i32, i32, i32, i32
  }
}

</mosaic_0001>

<bundles_post_ra>
// kernel: tpu_custom_call.1
= control target key start
LH: loop header
LB: loop body
LE: loop exit
PB: predicated region body
PF: predicated region fallthrough
CT: control target
= control target key end

     0   :  { %s1854_s0 = inlined_call_operand.hbm [shape: f32[2,8,32], index: 0, kind: input, shape index: {}]   ;;  %s1855_s1 = inlined_call_operand.vmem [shape: f32[1,32], index: 1, kind: input, shape index: {}]   ;;  %s1856_s2 = inlined_call_operand.vmem [shape: f32[1,32], index: 2, kind: input, shape index: {}]   ;;  %s1857_s3 = inlined_call_operand.hbm [shape: bf16[32,96], index: 3, kind: input, shape index: {}]   ;;  %s1858_s4 = inlined_call_operand.vmem [shape: f32[1,96], index: 4, kind: input, shape index: {}]   ;;  %s1859_s5 = inlined_call_operand.hbm [shape: bf16[2,4,8,8], index: 5, kind: output, shape index: {0}]   ;;  %s1860_s6 = inlined_call_operand.hbm [shape: bf16[2,4,8,8], index: 6, kind: output, shape index: {1}]   ;;  %s1861_s7 = inlined_call_operand.hbm [shape: bf16[2,4,8,8], index: 7, kind: output, shape index: {2}]  }
   0x1   :  { %1867 = sst [smem:[#allocation16_spill]] %s1857_s3 }
   0x2   :  { %13 = vsyncpa [#allocation3], 0 }
   0x3   :  { %15 = vsyncpa [#allocation3 + $0x1], 0 }
   0x4   :  { %16 = vsyncpa [#allocation6], 0 }
   0x5   :  { %17 = vsyncpa [#allocation4], 0 }
   0x6   :  { %19 = vsyncpa [#allocation4 + $0x1], 0 }
   0x7   :  { %20 = vsyncpa [#allocation9], 0 }
   0x8   :  { %22 = vsyncpa [#allocation9 + $0x1], 0  ;;  %s1533_s24 = smov 0   ;;  %s1535_s25 = smov 0  }
   0x9   :  { %s1537_s26 = smov 0   ;;  %s1539_s27 = smov 0  }
   0xa   :  { %s1541_s28 = smov 0   ;;  %s1543_s29 = smov 0  }
   0xb LB: > { %s1564_s30 = sadd.s32 4294967295, %s1480_s29   ;;  %s1865_s8 = sadd.s32 4294967294, %s1480_s29   ;;  %s1480_s29 = sphi %s1543_s29, %s28_s29   ;;  %s1476_s28 = sphi %s1541_s28, %s1890_s28   ;;  %s1472_s27 = sphi %s1539_s27, %s1889_s27   ;;  %s1468_s26 = sphi %s1537_s26, %s1888_s26   ;;  %s1464_s25 = sphi %s1535_s25, %s1887_s25   ;;  %s1460_s24 = sphi %s1533_s24, %s1886_s24  }
   0xc   : > { %p62_p0 = scmp.ne.s32.totalorder %s1464_s25, %s1460_s24  ;;  %p1862_p1 = scmp.eq.s32.totalorder %s1564_s30, 0 }
   0xd   : > { %p178_p3 = scmp.eq.s32.totalorder %s1865_s8, 1  ;;  %p1113_p5 = scmp.ge.s32.totalorder %s1480_s29, 1 }
   0xe   : > { %p1575_p4 = por %p1862_p1, %p62_p0  ;;  %p241_p7 = scmp.lt.s32.totalorder %s1480_s29, 3 }
   0xf   : > { %p1580_p6 = por %p178_p3, %p62_p0  ;;  %s1482_s12 = smov [#allocation5]  }
  0x10   : > { %s1868_s9 = scalar_select %p1575_p4, 1, 0 }
  0x11   : > { %s1869_s10 = scalar_select %p1580_p6, 1, 0 }
  0x12   : > { %p1585_p8 = pnand %p1113_p5, %p241_p7  ;;  %s259_s13 = sshll.u32 %s1482_s12, 4  ;;  %s260_s13 = int_to_ptr.vmem [resolvable:$true] %s259_s13 }
  0x13   : > { %s40_s15 = sadd.s32 1, %s1476_s28  ;;  %s1872_s3 = sld [smem:[#allocation16_spill]] }
  0x14   : > { %s1870_s11 = scalar_select %p1585_p8, 1, 0 }
  0x15   : > { %p1167_p9 = pneg %p1585_p8 }
  0x17   : > { %p1594_p11 = pnand %p1167_p9, %p1862_p1 }
  0x19   : > { %s1276_s18 = scalar_lea.hbm %s1872_s3, 256  ;;  %p1278_p13 = pneg %p1594_p11 }
  0x1a   : > { %p1277_p12 = scmp.ne.s32.totalorder %s1872_s3, %s1276_s18  ;;  %p1283_p5 = scmp.lt.u32.totalorder %s1276_s18, %s1872_s3 }
  0x1c   : > { %p1279_p0 = pnand %p1278_p13, %p1277_p12 }
  0x1e   : > { %p1280_p3 = pneg %p1279_p0 }
  0x20   : > { %p1285_p7 = pnand %p1283_p5, %p1280_p3 }
  0x22   : > { %1288 = shalt.err (!%p1285_p7)
}
  0x23   : > { %s1289_s23 = scalar_lea.vmem %s260_s13, 256  ;;  %p1297_p2 = scmp.lt.s32.totalorder %s260_s13, %s260_s13 }
  0x24   : > { %p1290_p9 = scmp.ne.s32.totalorder %s260_s13, %s1289_s23  ;;  %p1298_p6 = scmp.lt.s32.totalorder %s1289_s23, %s1289_s23 }
  0x26   : > { %p1292_p10 = pnand %p1290_p9, %p1278_p13  ;;  %p1299_p4 = por %p1298_p6, %p1297_p2 }
  0x28   : > { %p1293_p1 = pneg %p1292_p10 }
  0x2a   : > { %p1300_p8 = pnand %p1299_p4, %p1293_p1 }
  0x2c   : > { %1303 = shalt.err (!%p1300_p8)
}
  0x2d   : > { %s1483_s12 = smov 64   ;;  %s1484_s16 = smov 4  }
  0x2e   : > { %1170 = dma.hbm_to_vmem [thread:$0]  (!%p1594_p11), %s1872_s3, 256, %s260_s13, [#allocation6], %s1483_s12, %s1483_s12, %s1484_s16  }
  0x2f   : > { %p42_p1 = scmp.ge.s32.totalorder %s40_s15, 2  ;;  %s49_s19 = sadd.s32 1, %s1468_s26 }
  0x30   : > { %p56_p2 = scmp.ne.s32.totalorder %s1468_s26, %s1464_s25  ;;  %p57_p4 = scmp.eq.s32.totalorder %s1480_s29, 0 }
  0x31   : > { %s1892_s15 = smov (%p42_p1, %s40_s15), 0  ;;  %p1875_p8 = scmp.eq.s32.totalorder %s1564_s30, 1 }
  0x32   : > { %1873 = sst [smem:[#allocation15_spill]] %s1892_s15  ;;  %p1621_p6 = por %p57_p4, %p56_p2 }
  0x33   : > { %p1627_p10 = por %p1875_p8, %p56_p2  ;;  %s44_s14 = ssub.s32 %s1476_s28, %s1892_s15 }
  0x34   : > { %p1186_p12 = scmp.lt.s32.totalorder %s1480_s29, 2  ;;  %p47_p11 = scmp.eq.s32.totalorder %s44_s14, 0 }
  0x35   : > { %s276_s13 = sand.u32 1, %s1468_s26   ;;  %s1117_s12 = sshll.u32 %s1476_s28, 7 }
  0x36   : > { %s1116_s22 = sshll.u32 %s276_s13, 3  ;;  %s1642_s18 = scalar_lea.hbm %s1854_s0, %s1117_s12 }
  0x37   : > { %s1636_s23 = scalar_select %p47_p11, %s1468_s26, %s49_s19  }
  0x38   : > { %s280_s8 = scalar_lea.vmem [#allocation2], %s1116_s22  ;;  %p1648_p13 = pnand %p1186_p12, %p1621_p6 }
  0x39   : > { %s288_s3 = sshll.u32 %s280_s8, 4  ;;  %s277_s19 = scalar_lea.sflag [#allocation3], %s276_s13  ;;  %s1644_s3 = int_to_ptr.vmem [resolvable:$true] %s288_s3 }
  0x3a   : > { %s1304_s15 = scalar_lea.hbm %s1642_s18, 128  ;;  %p1306_p3 = pneg %p1648_p13 }
  0x3b   : > { %p1305_p0 = scmp.ne.s32.totalorder %s1642_s18, %s1304_s15  ;;  %s1309_s12 = scalar_lea.hbm %s1854_s0, 256 }
  0x3c   : > { %p1310_p9 = scmp.lt.u32.totalorder %s1642_s18, %s1854_s0  ;;  %p1311_p1 = scmp.lt.u32.totalorder %s1309_s12, %s1304_s15 }
  0x3d   : > { %p1307_p5 = pnand %p1306_p3, %p1305_p0  ;;  %p1313_p4 = scmp.lt.u32.totalorder %s1304_s15, %s1642_s18 }
  0x3e   : > { %p1312_p2 = por %p1311_p1, %p1310_p9 }
  0x3f   : > { %p1308_p7 = pneg %p1307_p5 }
  0x40   : > { %p1314_p6 = por %p1313_p4, %p1312_p2 }
  0x42   : > { %p1315_p8 = pnand %p1314_p6, %p1308_p7 }
  0x44   : > { %1318 = shalt.err (!%p1315_p8)
}
  0x45   : > { %s1319_s13 = scalar_lea.vmem %s1644_s3, 128  ;;  %s1485_s17 = smov [#allocation2]  }
  0x46   : > { %p1320_p12 = scmp.ne.s32.totalorder %s1644_s3, %s1319_s13  ;;  %s1324_s22 = sshll.u32 %s1485_s17, 4  ;;  %s1325_s22 = int_to_ptr.vmem [resolvable:$false] %s1324_s22 }
  0x47   : > { %s1326_s8 = scalar_lea.vmem %s1325_s22, 256  ;;  %p1327_p5 = scmp.lt.s32.totalorder %s1644_s3, %s1325_s22 }
  0x48   : > { %p1322_p11 = pnand %p1320_p12, %p1306_p3  ;;  %p1328_p9 = scmp.lt.s32.totalorder %s1326_s8, %s1319_s13 }
  0x4a   : > { %p1323_p0 = pneg %p1322_p11  ;;  %p1329_p1 = por %p1328_p9, %p1327_p5 }
  0x4c   : > { %p1330_p2 = pnand %p1329_p1, %p1323_p0 }
  0x4e   : > { %1333 = shalt.err (!%p1330_p2)
}
  0x4f   : > { %1174 = dma.hbm_to_vmem [thread:$0]  (!%p1648_p13), %s1642_s18, 128, %s1644_s3, %s277_s19  }
  0x50   : > { %p1878_p7 = scmp.ne.s32.totalorder %s1870_s11, 0 }
  0x51   : > { %s1680_s15 = sand.u32 (!%p1878_p7), 1, %s1464_s25   ;;  %p1879_p3 = scmp.ne.s32.totalorder (!%p1878_p7), %s1868_s9, 0 }
  0x52   : > { %297 = sbr.rel (%p1878_p7) target bundleno = 961 (0x3c1), region = 40  ;;  %s1119_s12 = sshll.u32 (!%p1878_p7), %s1680_s15, 3 }
  0x53   : > { %s300_s20 = scalar_lea.sflag (!%p1878_p7), [#allocation3], %s1680_s15  ;;  %s303_s16 = scalar_lea.vmem (!%p1878_p7), [#allocation2], %s1119_s12 }
  0x59   : > { %1443 = dma.done.wait (%p1879_p3), %s300_s20, 128  }
  0x5a   : > { %1445 = vsyncadd (%p1879_p3), %s300_s20, 4294967168  ;;  %p1880_p4 = scmp.eq.s32.totalorder %s1564_s30, 0 }
  0x5c   : > { %1447 = dma.done.wait (%p1880_p4), [#allocation6], 256   ;;  %p1881_p13 = pmov %p1880_p4 }
  0x5d   : > { %vm350_vm0 = vcmask 261120   ;;  %v349_v0 = vld [vmem:[%s303_s16] sm:$0xff]  ;;  %v1272_v7 = vld [vmem:[#allocation5] sm:$0xff]   ;;  %v1486_v8 = vmov 0.0   ;;  %vm1487_vm1 = vmmov 0   ;;  %v1273_v9 = vld [vmem:[#allocation5 + $0x8] sm:$0xff]  }
  0x5e   : > { %1449 = vsyncadd (%p1881_p13), [#allocation6], 4294967040  ;;  %v351_v1 = vsel %vm350_vm0, %v349_v0, 0.0  ;;  %1147 = vmatprep.subr.bf16.mxu0 %v1486_v8  ;;  %1151 = vmatprep.mubr.msk.bf16.mxu0 %vm1487_vm1, %v1486_v8  ;;  %v1124_v14 = vld [vmem:[%s1855_s1] ss:$0 sm:$0xff]  ;;  %s1705_s13 = sshll.u32 %s1680_s15, 4 }
  0x5f   : > { %352 = vadd.xlane.f32.xlu0 %v351_v1  ;;  %1148 = vmatpush3.bf16.msra.mxu0 %v1272_v7  ;;  %v1125_v16 = vld [vmem:[%s1856_s2] ss:$0 sm:$0xff]  ;;  %vm616_vm2 = vcmask 60416   ;;  %s333_s17 = scalar_lea.vmem [#allocation7], %s1705_s13  ;;  %s1711_s8 = sshll.u32 %s1472_s27, 8 }
  0x60   : > { %1149 = vmatprep.subr.bf16.mxu0 %v1486_v8  ;;  %v1126_v20 = vld [vmem:[%s1858_s4] ss:$0 sm:$0xff]  ;;  %s918_s22 = sshll.u32 %s333_s17, 4  ;;  %s1720_s16 = scalar_lea.hbm %s1859_s5, %s1711_s8  ;;  %s1713_s22 = int_to_ptr.vmem [resolvable:$true] %s918_s22 }
  0x61   : > { %s894_s3 = scalar_lea.sflag [#allocation4], %s1680_s15  ;;  %s1334_s27 = scalar_lea.vmem %s1713_s22, 256 }
  0x62   : > { %p1335_p6 = scmp.ne.s32.totalorder %s1713_s22, %s1334_s27  ;;  %s1488_s9 = smov [#allocation7]  }
  0x63   : > { %1150 = vmatpush3.bf16.msra.mxu0 %v1273_v9  ;;  %s1338_s11 = sshll.u32 %s1488_s9, 4  ;;  %s1339_s11 = int_to_ptr.vmem [resolvable:$false] %s1338_s11 }
  0x64   : > { %p1336_p8 = pnand %p1335_p6, %p1627_p10  ;;  %s1340_s18 = scalar_lea.vmem %s1339_s11, 512 }
  0x65   : > { %p1341_p11 = scmp.lt.s32.totalorder %s1713_s22, %s1339_s11  ;;  %p1342_p0 = scmp.lt.s32.totalorder %s1340_s18, %s1334_s27 }
  0x66   : > { %p1337_p12 = pneg %p1336_p8 }
  0x67   : > { %p1343_p5 = por %p1342_p0, %p1341_p11 }
  0x69   : > { %p1344_p9 = pnand %p1343_p5, %p1337_p12 }
  0xec   : > { %v353_v2 = vpop.xlane.xlu0 %352 }
  0xed   : > { %v355_v3 = vmul.f32 0.03125, %v353_v2 }
  0xef   : > { %v356_v4 = vsub.f32 %v349_v0, %v355_v3 }
  0xf1   : > { %v357_v5 = vmul.f32 %v356_v4, %v356_v4 }
  0xf3   : > { %v358_v6 = vsel %vm350_vm0, %v357_v5, 0.0 }
  0xf4   : > { %359 = vadd.xlane.f32.xlu0 %v358_v6 }
 0x181   : > { %v360_v10 = vpop.xlane.xlu0 %359 }
 0x182   : > { %v361_v11 = vmul.f32 0.03125, %v360_v10 }
 0x184   : > { %v362_v12 = vadd.f32 1e-05, %v361_v11 }
 0x186   : > { %1274 = vrsqrt.f32 %v362_v12 }
 0x190   : > { %v1275_v13 = vpop.eup %1274 }
 0x191   : > { %v364_v15 = vmul.f32 %v1275_v13, %v356_v4 }
 0x193   : > { %v372_v17 = vmul.f32 %v1124_v14, %v364_v15 }
 0x195   : > { %v380_v18 = vadd.f32 %v1125_v16, %v372_v17 }
 0x197   : > { %v381_v19 = vpack.c.bf16 %v380_v18, %v380_v18 }
 0x199   : > { %1152 = vmatmul.mubr.msk.bf16.vlgmr.msra.gmra.mrb[0].mxu0 %vm350_vm0, %v381_v19 }
 0x26c   : > { %v442_v21 = vpop.f32.mrb[0].mxu0 }
 0x26d   : > { %v1153_v22 = vpop.f32.mrb[1].mxu0  ;;  %v443_v23 = vadd.f32 %v1126_v20, %v442_v21 }
 0x26e   : > { %v445_v24 = vpop.f32.mrb[2].mxu0 }
 0x26f   : > { %448 = vxpose.xlu1.b32.start.end [1/1] (short) (narrow) %v443_v23, 96  ;;  %v1154_v25 = vpop.f32.mrb[3].mxu0 }
 0x2ef   : > { %v464_v26 = vpop.trf.xlu1 }
 0x2f0   : > { %480 = vxpose.xlu1.b32.start.end [1/1] (short) (narrow) %v464_v26, 8 }
 0x2f3   : > { %v465_v27 = vpop.trf.xlu1 }
 0x2f4   : > { %512 = vxpose.xlu0.b32.start.end [1/1] (short) (narrow) %v465_v27, 8 }
 0x2f7   : > { %v466_v28 = vpop.trf.xlu1 }
 0x2f8   : > { %544 = vxpose.xlu1.b32.start.end [1/1] (short) (narrow) %v466_v28, 8 }
 0x2fb   : > { %v467_v29 = vpop.trf.xlu1 }
 0x2fc   : > { %576 = vxpose.xlu0.b32.start.end [1/1] (short) (narrow) %v467_v29, 8 }
 0x2ff   : > { %v468_v30 = vpop.trf.xlu1 }
 0x303   : > { %v469_v31 = vpop.trf.xlu1 }
 0x304   : > { %v1244_v32 = vpack.i.bf16 %v469_v31, %v468_v30 }
 0x306   : > { %1245 = vxpose.xlu1.b32.start.end [1/1] (short) (narrow) %v1244_v32, 8 }
 0x307   : > { %v470_v33 = vpop.trf.xlu1 }
 0x30b   : > { %v471_v34 = vpop.trf.xlu1 }
 0x30c   : > { %v1251_v35 = vpack.i.bf16 %v471_v34, %v470_v33 }
 0x30e   : > { %1252 = vxpose.xlu0.b32.start.end [1/1] (short) (narrow) %v1251_v35, 8 }
 0x30f   : > { %v472_v36 = vpop.trf.xlu1 }
 0x313   : > { %v473_v37 = vpop.trf.xlu1 }
 0x314   : > { %v1258_v38 = vpack.i.bf16 %v473_v37, %v472_v36 }
 0x316   : > { %1259 = vxpose.xlu1.b32.start.end [1/1] (short) (narrow) %v1258_v38, 8 }
 0x317   : > { %v474_v39 = vpop.trf.xlu1 }
 0x31b   : > { %v475_v40 = vpop.trf.xlu1 }
 0x31c   : > { %v1265_v41 = vpack.i.bf16 %v475_v40, %v474_v39 }
 0x31e   : > { %1266 = vxpose.xlu0.b32.start.end [1/1] (short) (narrow) %v1265_v41, 8 }
 0x370   : > { %v496_v42 = vpop.trf.xlu1 }
 0x371   : > { %v608_v43 = vmul.f32 0.35355338, %v496_v42 }
 0x373   : > { %v612_v44 = vpack.c.bf16 %v608_v43, %v608_v43 }
 0x374   : > { %v528_v45 = vpop.trf.xlu0 }
 0x375   : > { %v609_v46 = vmul.f32 0.35355338, %v528_v45  ;;  %617 = vst.msk [vmem:[%s333_s17] sm:$0xf] %vm616_vm2, %v612_v44 }
 0x377   : > { %v613_v47 = vpack.c.bf16 %v609_v46, %v609_v46 }
 0x378   : > { %v560_v48 = vpop.trf.xlu1 }
 0x379   : > { %618 = vst.msk [vmem:[%s333_s17 + $0x4] sm:$0xf] %vm616_vm2, %v613_v47  ;;  %v610_v49 = vmul.f32 0.35355338, %v560_v48 }
 0x37b   : > { %v614_v50 = vpack.c.bf16 %v610_v49, %v610_v49 }
 0x37c   : > { %v592_v51 = vpop.trf.xlu0 }
 0x37d   : > { %v611_v52 = vmul.f32 0.35355338, %v592_v51  ;;  %619 = vst.msk [vmem:[%s333_s17 + $0x8] sm:$0xf] %vm616_vm2, %v614_v50 }
 0x37f   : > { %v615_v53 = vpack.c.bf16 %v611_v52, %v611_v52 }
 0x381   : > { %620 = vst.msk [vmem:[%s333_s17 + $0xc] sm:$0xf] %vm616_vm2, %v615_v53 }
 0x382   : > { %1347 = shalt.err (!%p1344_p9)
}
 0x383   : > { %s1348_s14 = scalar_lea.hbm %s1720_s16, 256  ;;  %s1352_s12 = scalar_lea.hbm %s1859_s5, 512 }
 0x384   : > { %p1349_p1 = scmp.ne.s32.totalorder %s1720_s16, %s1348_s14  ;;  %p1353_p3 = scmp.lt.u32.totalorder %s1720_s16, %s1859_s5 }
 0x385   : > { %p1354_p4 = scmp.lt.u32.totalorder %s1352_s12, %s1348_s14  ;;  %p1356_p6 = scmp.lt.u32.totalorder %s1348_s14, %s1720_s16 }
 0x386   : > { %p1350_p2 = pnand %p1349_p1, %p1627_p10 }
 0x387   : > { %p1355_p13 = por %p1354_p4, %p1353_p3 }
 0x388   : > { %p1351_p7 = pneg %p1350_p2 }
 0x389   : > { %p1357_p8 = por %p1356_p6, %p1355_p13 }
 0x38b   : > { %p1358_p12 = pnand %p1357_p8, %p1351_p7 }
 0x38d   : > { %1361 = shalt.err (!%p1358_p12)
}
 0x38e   : > { %s1489_s27 = smov 64   ;;  %s1490_s11 = smov 4   ;;  %v1246_v54 = vpop.trf.xlu1  ;;  %v1253_v59 = vpop.trf.xlu0 }
 0x38f   : > { %1161 = dma.vmem_to_hbm [thread:$0]  (%p1627_p10), %s1713_s22, 256, %s1720_s16, %s894_s3, %s1489_s27, %s1489_s27, %s1490_s11   ;;  %v1250_v55 = vunpack.i.h.bf16 %v1246_v54  ;;  %v1247_v56 = vunpack.i.l.bf16 %v1246_v54  ;;  %v1257_v60 = vunpack.i.h.bf16 %v1253_v59  ;;  %v1254_v61 = vunpack.i.l.bf16 %v1253_v59 }
 0x390   : > { %s340_s18 = scalar_lea.vmem [#allocation8], %s1705_s13  ;;  %s898_s14 = sand.u32 1, %s1564_s30  }
 0x391   : > { %v750_v57 = vpack.c.bf16 %v1250_v55, %v1250_v55  ;;  %v749_v58 = vpack.c.bf16 %v1247_v56, %v1247_v56  ;;  %s935_s19 = sshll.u32 %s340_s18, 4  ;;  %v752_v62 = vpack.c.bf16 %v1257_v60, %v1257_v60  ;;  %v751_v63 = vpack.c.bf16 %v1254_v61, %v1254_v61  ;;  %s1758_s16 = scalar_lea.hbm %s1860_s6, %s1711_s8  ;;  %s1760_s19 = int_to_ptr.vmem [resolvable:$true] %s935_s19 }
 0x392   : > { %s1764_s30 = scalar_lea.sflag [#allocation9], %s898_s14  ;;  %s1362_s3 = scalar_lea.vmem %s1760_s19, 256 }
 0x393   : > { %754 = vst.msk [vmem:[%s340_s18 + $0x4] sm:$0xf] %vm616_vm2, %v750_v57  ;;  %753 = vst.msk [vmem:[%s340_s18] sm:$0xf] %vm616_vm2, %v749_v58  ;;  %p1363_p11 = scmp.ne.s32.totalorder %s1760_s19, %s1362_s3  ;;  %s1491_s17 = smov [#allocation8]  }
 0x394   : > { %756 = vst.msk [vmem:[%s340_s18 + $0xc] sm:$0xf] %vm616_vm2, %v752_v62  ;;  %755 = vst.msk [vmem:[%s340_s18 + $0x8] sm:$0xf] %vm616_vm2, %v751_v63  ;;  %s1366_s12 = sshll.u32 %s1491_s17, 4  ;;  %s1367_s12 = int_to_ptr.vmem [resolvable:$false] %s1366_s12 }
 0x395   : > { %p1364_p0 = pnand %p1363_p11, %p1627_p10  ;;  %s1368_s20 = scalar_lea.vmem %s1367_s12, 512 }
 0x396   : > { %p1369_p9 = scmp.lt.s32.totalorder %s1760_s19, %s1367_s12  ;;  %p1370_p1 = scmp.lt.s32.totalorder %s1368_s20, %s1362_s3 }
 0x397   : > { %p1365_p5 = pneg %p1364_p0 }
 0x398   : > { %p1371_p2 = por %p1370_p1, %p1369_p9 }
 0x39a   : > { %p1372_p7 = pnand %p1371_p2, %p1365_p5 }
 0x39c   : > { %1375 = shalt.err (!%p1372_p7)
}
 0x39d   : > { %s1376_s9 = scalar_lea.hbm %s1758_s16, 256  ;;  %s1380_s15 = scalar_lea.hbm %s1860_s6, 512 }
 0x39e   : > { %p1377_p3 = scmp.ne.s32.totalorder %s1758_s16, %s1376_s9  ;;  %p1381_p6 = scmp.lt.u32.totalorder %s1758_s16, %s1860_s6 }
 0x39f   : > { %p1382_p8 = scmp.lt.u32.totalorder %s1380_s15, %s1376_s9  ;;  %p1384_p11 = scmp.lt.u32.totalorder %s1376_s9, %s1758_s16 }
 0x3a0   : > { %p1378_p4 = pnand %p1377_p3, %p1627_p10 }
 0x3a1   : > { %p1383_p12 = por %p1382_p8, %p1381_p6 }
 0x3a2   : > { %p1379_p13 = pneg %p1378_p4 }
 0x3a3   : > { %p1385_p0 = por %p1384_p11, %p1383_p12 }
 0x3a5   : > { %p1386_p5 = pnand %p1385_p0, %p1379_p13 }
 0x3a7   : > { %1389 = shalt.err (!%p1386_p5)
}
 0x3a8   : > { %1162 = dma.vmem_to_hbm [thread:$0]  (%p1627_p10), %s1760_s19, 256, %s1758_s16, %s1764_s30, %s1489_s27, %s1489_s27, %s1490_s11   ;;  %v1260_v0 = vpop.trf.xlu1  ;;  %v1267_v5 = vpop.trf.xlu0 }
 0x3a9   : > { %v1264_v1 = vunpack.i.h.bf16 %v1260_v0  ;;  %v1261_v2 = vunpack.i.l.bf16 %v1260_v0  ;;  %s347_s3 = scalar_lea.vmem [#allocation10], %s1705_s13  ;;  %v1271_v6 = vunpack.i.h.bf16 %v1267_v5  ;;  %v1268_v7 = vunpack.i.l.bf16 %v1267_v5  ;;  %s1800_s20 = scalar_lea.hbm %s1861_s7, %s1711_s8 }
 0x3aa   : > { %s952_s12 = sshll.u32 %s347_s3, 4  ;;  %s1492_s9 = smov [#allocation10]   ;;  %s1794_s12 = int_to_ptr.vmem [resolvable:$true] %s952_s12 }
 0x3ab   : > { %v886_v3 = vpack.c.bf16 %v1264_v1, %v1264_v1  ;;  %v885_v4 = vpack.c.bf16 %v1261_v2, %v1261_v2  ;;  %v888_v8 = vpack.c.bf16 %v1271_v6, %v1271_v6  ;;  %v887_v9 = vpack.c.bf16 %v1268_v7, %v1268_v7  ;;  %s1390_s13 = scalar_lea.vmem %s1794_s12, 256  ;;  %s1394_s18 = sshll.u32 %s1492_s9, 4  ;;  %s1395_s18 = int_to_ptr.vmem [resolvable:$false] %s1394_s18 }
 0x3ac   : > { %p1391_p9 = scmp.ne.s32.totalorder %s1794_s12, %s1390_s13  ;;  %s1396_s14 = scalar_lea.vmem %s1395_s18, 512 }
 0x3ad   : > { %890 = vst.msk [vmem:[%s347_s3 + $0x4] sm:$0xf] %vm616_vm2, %v886_v3  ;;  %889 = vst.msk [vmem:[%s347_s3] sm:$0xf] %vm616_vm2, %v885_v4  ;;  %p1397_p7 = scmp.lt.s32.totalorder %s1794_s12, %s1395_s18  ;;  %p1398_p3 = scmp.lt.s32.totalorder %s1396_s14, %s1390_s13 }
 0x3ae   : > { %892 = vst.msk [vmem:[%s347_s3 + $0xc] sm:$0xf] %vm616_vm2, %v888_v8  ;;  %891 = vst.msk [vmem:[%s347_s3 + $0x8] sm:$0xf] %vm616_vm2, %v887_v9  ;;  %p1392_p1 = pnand %p1391_p9, %p1627_p10 }
 0x3af   : > { %p1399_p4 = por %p1398_p3, %p1397_p7 }
 0x3b0   : > { %p1393_p2 = pneg %p1392_p1 }
 0x3b2   : > { %p1400_p13 = pnand %p1399_p4, %p1393_p2 }
 0x3b4   : > { %1403 = shalt.err (!%p1400_p13)
}
 0x3b5   : > { %s1404_s8 = scalar_lea.hbm %s1800_s20, 256  ;;  %s1408_s17 = scalar_lea.hbm %s1861_s7, 512 }
 0x3b6   : > { %p1405_p6 = scmp.ne.s32.totalorder %s1800_s20, %s1404_s8  ;;  %p1409_p11 = scmp.lt.u32.totalorder %s1800_s20, %s1861_s7 }
 0x3b7   : > { %p1410_p0 = scmp.lt.u32.totalorder %s1408_s17, %s1404_s8  ;;  %p1412_p9 = scmp.lt.u32.totalorder %s1404_s8, %s1800_s20 }
 0x3b8   : > { %p1406_p8 = pnand %p1405_p6, %p1627_p10 }
 0x3b9   : > { %p1411_p5 = por %p1410_p0, %p1409_p11 }
 0x3ba   : > { %p1407_p12 = pneg %p1406_p8 }
 0x3bb   : > { %p1413_p1 = por %p1412_p9, %p1411_p5 }
 0x3bd   : > { %p1414_p2 = pnand %p1413_p1, %p1407_p12 }
 0x3bf   : > { %1417 = shalt.err (!%p1414_p2)
}
 0x3c0   : > { %1163 = dma.vmem_to_hbm [thread:$0]  (%p1627_p10), %s1794_s12, 256, %s1800_s20, %s1764_s30, %s1489_s27, %s1489_s27, %s1490_s11  }
 0x3c1 PF: > { %s967_s16 = sand.u32 1, %s1460_s24   ;;  %p1882_p7 = scmp.ne.s32.totalorder %s1869_s10, 0 }
 0x3c2   : > { %p1883_p3 = scmp.ge.s32.totalorder %s1480_s29, 2  ;;  %s968_s13 = scalar_lea.sflag [#allocation4], %s967_s16 }
 0x3c4   : > { %p1176_p4 = pnand %p1883_p3, %p1882_p7 }
 0x3c6   : > { %1451 = dma.done.wait (!%p1176_p4), %s968_s13, 256  }
 0x3c7   : > { %1453 = vsyncadd (!%p1176_p4), %s968_s13, 4294967040  ;;  %s1884_s21 = sadd.s32 4294967294, %s1480_s29  }
 0x3c8   : > { %s976_s9 = sand.u32 1, %s1884_s21  }
 0x3c9   : > { %s977_s18 = scalar_lea.sflag [#allocation9], %s976_s9 }
 0x3ca   : > { %1455 = dma.done.wait (!%p1176_p4), %s977_s18, 512  }
 0x3cb   : > { %1457 = vsyncadd (!%p1176_p4), %s977_s18, 4294966784  ;;  %s28_s29 = sadd.s32 1, %s1480_s29   ;;  %s1885_s11 = sld [smem:[#allocation15_spill]] }
 0x3cc   : > { %p25_p10 = scmp.ge.s32.totalorder %s28_s29, 4   ;;  %s1886_s24 = smov %s1464_s25 }
 0x3cd   : > { %s1887_s25 = smov %s1468_s26  ;;  %s1888_s26 = smov %s1636_s23 }
 0x3ce   : > { %s1889_s27 = smov %s1476_s28  ;;  %27 = sbr.rel (!%p25_p10) target bundleno = 11 (0xb), region = 121 }
 0x3d1   : > { %s1890_s28 = smov %s1885_s11 }
 0x3d5   :  { %991 = vsyncpa [#allocation3], 1 }
 0x3d6   :  { %993 = vsyncpa [#allocation3 + $0x1], 1 }
 0x3d7   :  { %994 = vsyncpa [#allocation6], 1 }
 0x3d8   :  { %995 = vsyncpa [#allocation4], 1 }
 0x3d9   :  { %997 = vsyncpa [#allocation4 + $0x1], 1 }
 0x3da   :  { %998 = vsyncpa [#allocation9], 1 }
 0x3db   :  { %1000 = vsyncpa [#allocation9 + $0x1], 1 }

</bundles_post_ra>
